<compile_context>
chip_gen: v6e
topology: v6e:2x2x1
jax: 0.10.0
libtpu: 0.0.40
codegen_flags: <defaults>
</compile_context>

<pallas_src>
import jax
import jax.numpy as jnp
from jax.experimental import pallas as pl
from jax.experimental.pallas import tpu as pltpu


def _get_loss_kernel(lam_ref, bpp_ref, cd_ref, out_ref):
    # All refs are (1,) f32 in SMEM; single scalar FMA on the sALU path.
    out_ref[0] = lam_ref[0] * cd_ref[0] + bpp_ref[0]


def get_loss(bpp, cd_loss, lam=1.0):
    """Returns (lam * cd_loss + bpp, cd_loss, bpp), matching the nn.Module."""
    bpp_f = jnp.asarray(bpp, jnp.float32)
    cd_f = jnp.asarray(cd_loss, jnp.float32)
    lam_f = jnp.asarray(lam, jnp.float32)

    total = pl.pallas_call(
        _get_loss_kernel,
        out_shape=jax.ShapeDtypeStruct((1,), jnp.float32),
        in_specs=[
            pl.BlockSpec(memory_space=pltpu.SMEM),  # lam
            pl.BlockSpec(memory_space=pltpu.SMEM),  # bpp
            pl.BlockSpec(memory_space=pltpu.SMEM),  # cd_loss
        ],
        out_specs=pl.BlockSpec(memory_space=pltpu.SMEM),
    )(lam_f.reshape((1,)), bpp_f.reshape((1,)), cd_f.reshape((1,)))

    return total[0].reshape(bpp_f.shape), cd_f, bpp_f


if __name__ == "__main__":
    key = jax.random.PRNGKey(0)
    k_bpp, k_cd = jax.random.split(key)
    # Small scalar losses, as produced upstream in the compressor model.
    bpp = jax.random.uniform(k_bpp, (), jnp.float32, minval=0.0, maxval=2.0)
    cd_loss = jax.random.uniform(k_cd, (), jnp.float32, minval=0.0, maxval=1.0)

    lam = 1.0
    total, cd_out, bpp_out = get_loss(bpp, cd_loss, lam=lam)
    jax.block_until_ready(total)

    # Reference check (pure JAX).
    ref = lam * cd_loss + bpp
    assert jnp.allclose(total, ref, rtol=1e-6, atol=1e-6)
    assert jnp.allclose(cd_out, cd_loss)
    assert jnp.allclose(bpp_out, bpp)

    print("KERNEL_OK")
</pallas_src>

<mosaic_0001>
module attributes {stable_mosaic.version = 11 : i64} {
  func.func @_get_loss_kernel(%arg0: memref<1xf32, #tpu.memory_space<smem>>, %arg1: memref<1xf32, #tpu.memory_space<smem>>, %arg2: memref<1xf32, #tpu.memory_space<smem>>, %arg3: memref<1xf32, #tpu.memory_space<smem>>) attributes {dimension_semantics = [], scalar_prefetch = 0 : i64, scratch_operands = 0 : i64, tpu.core_type = #tpu.core_type<tc>} {
    %c0 = arith.constant 0 : index
    %0 = memref.load %arg0[%c0] : memref<1xf32, #tpu.memory_space<smem>>
    %c0_0 = arith.constant 0 : index
    %1 = memref.load %arg2[%c0_0] : memref<1xf32, #tpu.memory_space<smem>>
    %2 = arith.mulf %0, %1 : f32
    %c0_1 = arith.constant 0 : index
    %3 = memref.load %arg1[%c0_1] : memref<1xf32, #tpu.memory_space<smem>>
    %4 = arith.addf %2, %3 : f32
    %c0_2 = arith.constant 0 : index
    %5 = memref.load %arg3[%c0_2] : memref<1xf32, #tpu.memory_space<smem>>
    memref.store %4, %arg3[%c0_2] : memref<1xf32, #tpu.memory_space<smem>>
    return
  }
}

</mosaic_0001>

<bundles_post_ra>
// kernel: tpu_custom_call.1
= control target key start
LH: loop header
LB: loop body
LE: loop exit
PB: predicated region body
PF: predicated region fallthrough
CT: control target
= control target key end

     0   :  { %11 = vsyncpa [#allocation6], 0  ;;  %s49_s20 = smov [#allocation5]   ;;  %s82_s0 = inlined_call_operand.<no memory space> [shape: f32[1], index: 0, kind: input, shape index: {}]   ;;  %s83_s1 = inlined_call_operand.<no memory space> [shape: f32[1], index: 1, kind: input, shape index: {}]   ;;  %s84_s2 = inlined_call_operand.<no memory space> [shape: f32[1], index: 2, kind: input, shape index: {}]   ;;  %s85_s3 = inlined_call_operand.hbm [shape: f32[1], index: 3, kind: output, shape index: {}]  }
   0x1   :  { %s20_s16 = smul.f32 %s84_s2, %s82_s0 }
   0x3   :  { %s22_s19 = sadd.f32 %s20_s16, %s83_s1 }
   0x5   :  { %24 = sst [smem:[#allocation5]] %s22_s19 }
   0x6   :  { %32 = dma.smem_to_hbm %s49_s20, 16, %s85_s3, [#allocation6]  }
   0x7   :  { %47 = dma.done.wait [#allocation6], 16  }
   0x8   :  { %48 = vsyncadd [#allocation6], 4294967280 }
   0x9   :  { %36 = sfence }
   0xa   :  { %37 = vsyncpa [#allocation6], 1 }

</bundles_post_ra>
